<compile_context>
chip_gen: v6e
topology: v6e:2x2x1
jax: 0.10.0
libtpu: 0.0.40
codegen_flags: <defaults>
</compile_context>

<pallas_src>
import jax
import jax.numpy as jnp
from jax.experimental import pallas as pl
from jax.experimental.pallas import tpu as pltpu


_LANES = 512           # output last dim: large multiple of 128 -> unmasked vst
_TR_MAX = 512          # rows per tile; f32 in + i32 out, double-buffered ~4 MiB
_VMEM_LIMIT = 32 * 1024 * 1024  # explicit scoped-VMEM budget (safe on v5e/v6e/v7x)


def _partial_sum_kernel(x_ref, sum_ref):
    """x_ref: (TR, LANES) f32 VMEM tile; sum_ref: (1,) f32 SMEM accumulator."""
    @pl.when(pl.program_id(0) == 0)
    def _init():
        sum_ref[0] = jnp.float32(0.0)

    # Hierarchical reduction: tile -> scalar partial sum -> running SMEM sum.
    sum_ref[0] += jnp.sum(x_ref[...])


def _threshold_kernel(mean_ref, x_ref, o_ref):
    """mean_ref: (1,) f32 SMEM; x_ref: (TR, LANES) f32; o_ref: (TR, LANES) i32."""
    o_ref[...] = (x_ref[...] > mean_ref[0]).astype(jnp.int32)


def simple_net_forward(x):
    """Pallas equivalent of SimpleNet.forward: where(x > mean(x), 1, 0).

    Returns int32 (PyTorch would return int64; JAX/TPU default int width is 32).
    """
    # TODO(synk): torch computes the mean in float64; TPU vector units have no
    # f64 path, so the reduction is hierarchical float32 (per-tile sums, then a
    # scalar running sum) — close to, but not bit-identical with, the f64 mean.
    orig_shape = x.shape
    n = int(x.size)
    x_flat = x.reshape(-1).astype(jnp.float32)

    # Lane-dense 2-D layout, zero-padded so row tiles divide evenly.
    rows = -(-n // _LANES)
    if rows <= _TR_MAX:
        tr = rows                      # single tile == full array dims (legal block)
        rows_padded = rows
    else:
        tr = _TR_MAX                   # (512, 512) tile: (8,128)-aligned
        rows_padded = -(-rows // tr) * tr
    total = rows_padded * _LANES
    if total != n:
        x_flat = jnp.pad(x_flat, (0, total - n))
    x2d = x_flat.reshape(rows_padded, _LANES)
    num_tiles = rows_padded // tr

    # ---- Pass 1: global sum (zero padding does not change it). ----
    total_sum = pl.pallas_call(
        _partial_sum_kernel,
        out_shape=jax.ShapeDtypeStruct((1,), jnp.float32),
        grid_spec=pltpu.PrefetchScalarGridSpec(
            num_scalar_prefetch=0,
            grid=(num_tiles,),
            in_specs=[pl.BlockSpec((tr, _LANES), lambda t: (t, 0))],
            out_specs=pl.BlockSpec(memory_space=pltpu.SMEM),
        ),
        compiler_params=pltpu.CompilerParams(
            dimension_semantics=("arbitrary",),   # sequential reduction axis
            vmem_limit_bytes=_VMEM_LIMIT,
        ),
        cost_estimate=pl.CostEstimate(
            flops=total, transcendentals=0, bytes_accessed=4 * total + 4),
    )(x2d)

    mean = (total_sum / jnp.float32(n)).astype(jnp.float32)   # shape (1,)

    # ---- Pass 2: threshold against the finalized mean. ----
    out2d = pl.pallas_call(
        _threshold_kernel,
        out_shape=jax.ShapeDtypeStruct((rows_padded, _LANES), jnp.int32),
        grid_spec=pltpu.PrefetchScalarGridSpec(
            num_scalar_prefetch=0,
            grid=(num_tiles,),
            in_specs=[pl.BlockSpec(memory_space=pltpu.SMEM),        # mean scalar
                      pl.BlockSpec((tr, _LANES), lambda t: (t, 0))],
            out_specs=pl.BlockSpec((tr, _LANES), lambda t: (t, 0)),
        ),
        compiler_params=pltpu.CompilerParams(
            dimension_semantics=("parallel",),    # independent tiles -> megacore
            vmem_limit_bytes=_VMEM_LIMIT,
        ),
        cost_estimate=pl.CostEstimate(
            flops=2 * total, transcendentals=0, bytes_accessed=8 * total + 4),
    )(mean, x2d)

    return out2d.reshape(-1)[:n].reshape(orig_shape)


if __name__ == "__main__":
    key = jax.random.PRNGKey(0)
    # NCHW input, small shapes: batch=2, channels=4, spatial=16x16.
    x = jax.random.normal(key, (2, 4, 16, 16), dtype=jnp.float32)

    out = jax.block_until_ready(simple_net_forward(x))

    # Reference check in plain JAX (same semantics as the PyTorch module).
    ref = jnp.where(x > jnp.mean(x), 1, 0).astype(jnp.int32)
    assert out.shape == x.shape and out.dtype == jnp.int32
    assert bool(jnp.all(out == ref))

    print("KERNEL_OK")
</pallas_src>

<mosaic_0001>
module attributes {stable_mosaic.version = 11 : i64} {
  func.func @_partial_sum_kernel(%arg0: i32, %arg1: memref<4x512xf32, #tpu.memory_space<vmem>>, %arg2: memref<1xf32, #tpu.memory_space<smem>>) attributes {dimension_semantics = [#tpu.dimension_semantics<arbitrary>], iteration_bounds = array<i64: 1>, scalar_prefetch = 0 : i64, scratch_operands = 0 : i64, tpu.core_type = #tpu.core_type<tc>, window_params = [{transform_indices = @transform_0, window_bounds = array<i64: 4, 512>}, {transform_indices = @transform_1, window_bounds = array<i64: 1>}]} {
    %c0_i32 = arith.constant 0 : i32
    %0 = arith.cmpi eq, %arg0, %c0_i32 : i32
    %1 = arith.extui %0 : i1 to i32
    %c0_i32_0 = arith.constant 0 : i32
    %2 = arith.cmpi ne, %1, %c0_i32_0 : i32
    scf.if %2 {
      %cst_4 = arith.constant 0.000000e+00 : f32
      %c0_5 = arith.constant 0 : index
      %11 = memref.load %arg2[%c0_5] : memref<1xf32, #tpu.memory_space<smem>>
      memref.store %cst_4, %arg2[%c0_5] : memref<1xf32, #tpu.memory_space<smem>>
    } else {
    }
    %c0 = arith.constant 0 : index
    %3 = memref.load %arg2[%c0] : memref<1xf32, #tpu.memory_space<smem>>
    %c0_1 = arith.constant 0 : index
    %c0_2 = arith.constant 0 : index
    %4 = vector.load %arg1[%c0_1, %c0_2] : memref<4x512xf32, #tpu.memory_space<vmem>>, vector<4x512xf32>
    %5 = vector.shape_cast %4 : vector<4x512xf32> to vector<1x4x512xf32>
    %cst = arith.constant dense<0.000000e+00> : vector<1xf32>
    %6 = vector.multi_reduction <add>, %5, %cst [1, 2] : vector<1x4x512xf32> to vector<1xf32>
    %7 = vector.shape_cast %6 : vector<1xf32> to vector<1x1x1xf32>
    %8 = vector.extract %7[0, 0, 0] : f32 from vector<1x1x1xf32>
    %9 = arith.addf %3, %8 : f32
    %c0_3 = arith.constant 0 : index
    %10 = memref.load %arg2[%c0_3] : memref<1xf32, #tpu.memory_space<smem>>
    memref.store %9, %arg2[%c0_3] : memref<1xf32, #tpu.memory_space<smem>>
    return
  }
  func.func @transform_0(%arg0: i32) -> (i32, i32) {
    %c0_i32 = arith.constant 0 : i32
    %c0_i32_0 = arith.constant 0 : i32
    return %arg0, %c0_i32 : i32, i32
  }
  func.func @transform_1(%arg0: i32) -> i32 {
    %c0_i32 = arith.constant 0 : i32
    %c0_i32_0 = arith.constant 0 : i32
    return %c0_i32 : i32
  }
}

</mosaic_0001>

<bundles_post_ra>
// kernel: tpu_custom_call.1
= control target key start
LH: loop header
LB: loop body
LE: loop exit
PB: predicated region body
PF: predicated region fallthrough
CT: control target
= control target key end

     0   :  { %6 = vsyncpa [#allocation3], 0  ;;  %s127_s0 = inlined_call_operand.hbm [shape: f32[4,512], index: 0, kind: input, shape index: {}]   ;;  %s128_s1 = inlined_call_operand.hbm [shape: f32[1], index: 1, kind: output, shape index: {}]  }
   0x1   :  { %7 = vsyncpa [#allocation4], 0  ;;  %s109_s6 = smov [#allocation2]  }
   0x2   :  { %s14_s7 = sshll.u32 %s109_s6, 4  ;;  %s15_s7 = int_to_ptr.vmem [resolvable:$true] %s14_s7 }
   0x3   :  { %s85_s8 = scalar_lea.vmem %s15_s7, 256  ;;  %p90_p1 = scmp.lt.s32.totalorder %s15_s7, %s15_s7 }
   0x4   :  { %p86_p0 = scmp.ne.s32.totalorder %s15_s7, %s85_s8  ;;  %p91_p2 = scmp.lt.s32.totalorder %s85_s8, %s85_s8 }
   0x6   :  { %p92_p3 = por %p91_p2, %p90_p1 }
   0x8   :  { %p93_p4 = pnand %p92_p3, %p86_p0 }
   0xa   :  { %96 = shalt.err (!%p93_p4)
}
   0xb   :  { %17 = dma.hbm_to_vmem [thread:$0]  %s127_s0, 256, %s15_s7, [#allocation3]  }
   0xc   :  { %105 = dma.done.wait [#allocation3], 256  }
   0xd   :  { %106 = vsyncadd [#allocation3], 4294967040  ;;  %vm36_vm0 = vcmask 1043456   ;;  %v28_v0 = vld [vmem:[#allocation2] sm:$0xff]  ;;  %v29_v1 = vld [vmem:[#allocation2 + $0x8] sm:$0xff]  ;;  %s110_s11 = smov [#allocation5]  }
   0xe   :  { %v32_v2 = vcombine.high %v28_v0, %v28_v0  ;;  %v33_v3 = vcombine.high %v29_v1, %v29_v1  ;;  %v37_v4 = vsel %vm36_vm0, %v28_v0, 0.0  ;;  %v40_v6 = vsel %vm36_vm0, %v29_v1, 0.0 }
  0x10   :  { %v38_v5 = vsel %vm36_vm0, %v32_v2, 0.0  ;;  %v42_v8 = vsel %vm36_vm0, %v33_v3, 0.0 }
  0x11   :  { %v39_v7 = vadd.f32 %v38_v5, %v37_v4 }
  0x13   :  { %v41_v9 = vadd.f32 %v40_v6, %v39_v7 }
  0x15   :  { %v43_v10 = vadd.f32 %v42_v8, %v41_v9 }
  0x17   :  { %44 = vadd.xlane.f32.xlu0 %v43_v10 }
  0xa0   :  { %v45_v11 = vpop.xlane.xlu0 %44 }
  0xa1   :  { %v46_v12 = vrot.slane %v45_v11, 4 }
  0xa3   :  { %v47_v13 = vadd.f32 %v46_v12, %v45_v11 }
  0xa5   :  { %v48_v14 = vrot.slane %v47_v13, 2 }
  0xa7   :  { %v49_v15 = vadd.f32 %v48_v14, %v47_v13 }
  0xa9   :  { %v50_v16 = vrot.slane %v49_v15, 1 }
  0xab   :  { %v51_v17 = vadd.f32 %v50_v16, %v49_v15 }
  0xad   :  { %70 = vpush %v51_v17 }
  0xde   :  { %s71_s0 = spop %70 }
  0xdf   :  { %55 = sst [smem:[#allocation5]] %s71_s0 }
  0xe0   :  { %63 = dma.smem_to_hbm %s110_s11, 16, %s128_s1, [#allocation4]  }
  0xe1   :  { %107 = dma.done.wait [#allocation4], 16  }
  0xe2   :  { %108 = vsyncadd [#allocation4], 4294967280 }
  0xe3   :  { %67 = sfence }
  0xe4   :  { %68 = vsyncpa [#allocation3], 1 }
  0xe5   :  { %69 = vsyncpa [#allocation4], 1 }

</bundles_post_ra>
